<compile_context>
chip_gen: v7x
topology: tpu7x:2x2x1
jax: 0.10.0
libtpu: 0.0.40
codegen_flags: <defaults>
</compile_context>

<pallas_src>
import functools

import jax
import jax.numpy as jnp
from jax.experimental import pallas as pl
from jax.experimental.pallas import tpu as pltpu

LANE = 128
SUBLANE = 8


def _round_up(x, m):
    return (x + m - 1) // m * m


def value_net_kernel(x_ref, w1_ref, b1_ref, w2_ref, b2_ref, o_ref, *, mxu_dtype):
    # x_ref : (TILE_B, S)   batch on sublanes, native layout
    # w1_ref: (S, H)        resident across grid steps (constant index_map)
    # b1_ref: (1, H)
    # w2_ref: (1, H)        fc2 weight as a row vector
    # b2_ref: (1, 1) SMEM scalar
    # o_ref : (TILE_B, 1)
    x = x_ref[...]
    w1 = w1_ref[...]
    if mxu_dtype != jnp.float32:
        # MXU is bf16-native on v5e/v6e/v7x; accumulate stays f32.
        x = x.astype(mxu_dtype)
        w1 = w1.astype(mxu_dtype)

    # fc1 on the MXU: (TILE_B, S) @ (S, H) -> (TILE_B, H), f32 accumulate.
    h = jnp.dot(x, w1, preferred_element_type=jnp.float32)
    # f32 epilogue on the VPU (keep f32: v5e has no bf16 VPU/EUP).
    h = jnp.maximum(h + b1_ref[...], 0.0)

    # fc2 as VPU multiply + lane reduce (avoids a degenerate (H,1) MXU matmul).
    v = jnp.sum(h * w2_ref[...], axis=-1, keepdims=True)      # (TILE_B, 1)
    o_ref[...] = (v + b2_ref[0, 0]).astype(o_ref.dtype)


def _vmem_tile_cap(state_dim, budget_bytes):
    """Largest batch tile whose double-buffered, lane-padded VMEM tiles fit the budget."""
    # x tile rows are lane-padded to >=128 lanes; (TILE_B, 1) output rows pad to 128 too.
    bytes_per_row = (_round_up(max(state_dim, 1), LANE) + LANE) * 4
    cap = budget_bytes // (2 * bytes_per_row)                  # x2 for double-buffering
    return max(SUBLANE, (cap // SUBLANE) * SUBLANE)


def value_net_forward(x, w1, b1, w2, b2, *, tile_b=8192, mxu_dtype=jnp.float32,
                      use_pallas=None, vmem_budget_bytes=24 * 1024 * 1024):
    """Forward pass of ValueNet.

    x : (B, state_dim) float32
    w1: (state_dim, hidden)   b1: (hidden,)
    w2: (hidden, 1)           b2: scalar / (1,)
    Returns (B, 1) float32.
    """
    B, S = x.shape
    H = w1.shape[1]

    if use_pallas is None:
        # At small sizes, launch + DMA setup dwarf the work; let XLA fuse it.
        use_pallas = B >= 4096
    if not use_pallas:
        return (jnp.maximum(x @ w1 + b1.reshape(1, H), 0.0)
                @ jnp.reshape(w2, (H, 1)) + jnp.reshape(jnp.asarray(b2), (1, 1)))

    # --- batch tiling ------------------------------------------------------
    b8 = _round_up(B, SUBLANE)
    tile = min(_round_up(tile_b, SUBLANE), _vmem_tile_cap(S, vmem_budget_bytes), b8)
    tile = max(SUBLANE, (tile // SUBLANE) * SUBLANE)
    # v7x megacore: make sure there are >= 2 grid steps whenever the batch is
    # big enough to split, so the "parallel" axis uses both TensorCores.
    if pl.cdiv(b8, tile) < 2 and b8 >= 2 * SUBLANE:
        tile = _round_up(pl.cdiv(b8, 2), SUBLANE)
    grid_b = pl.cdiv(b8, tile)
    b_final = grid_b * tile

    # Only pad when alignment actually requires it (no copy for well-shaped B).
    x_in = x.astype(jnp.float32)
    if b_final != B:
        x_in = jnp.pad(x_in, ((0, b_final - B), (0, 0)))

    w1f = w1.astype(jnp.float32)                               # (S, H)
    b1r = b1.reshape(1, H).astype(jnp.float32)                 # (1, H)
    w2r = jnp.reshape(w2, (1, H)).astype(jnp.float32)          # (1, H)
    b2s = jnp.asarray(b2, jnp.float32).reshape(1, 1)           # (1, 1) -> SMEM

    cost = pl.CostEstimate(
        flops=2 * b_final * S * H + 3 * b_final * H,
        transcendentals=0,
        bytes_accessed=4 * (b_final * S + S * H + 2 * H + 1 + b_final),
    )

    kernel = functools.partial(value_net_kernel, mxu_dtype=mxu_dtype)

    out = pl.pallas_call(
        kernel,
        out_shape=jax.ShapeDtypeStruct((b_final, 1), jnp.float32),
        grid=(grid_b,),
        in_specs=[
            # x streams over the batch grid axis in its native layout.
            # (If exposed DMA still shows up in profiles, add
            #  pipeline_mode=pl.Buffered(3) here only.)
            pl.BlockSpec((tile, S), lambda i: (i, 0)),
            # Weights / biases: constant index_map -> VMEM-resident across steps.
            pl.BlockSpec((S, H), lambda i: (0, 0)),
            pl.BlockSpec((1, H), lambda i: (0, 0)),
            pl.BlockSpec((1, H), lambda i: (0, 0)),
            pl.BlockSpec((1, 1), lambda i: (0, 0),
                         memory_space=pltpu.MemorySpace.SMEM),
        ],
        out_specs=pl.BlockSpec((tile, 1), lambda i: (i, 0)),
        compiler_params=pltpu.CompilerParams(
            dimension_semantics=("parallel",),
        ),
        cost_estimate=cost,
    )(x_in, w1f, b1r, w2r, b2s)

    return out[:B, :]


def init_params(key, state_dim, hidden_dim):
    """Deterministic init mimicking torch.nn.Linear (uniform(-1/sqrt(fan_in), ...))."""
    k1, k2, k3, k4 = jax.random.split(key, 4)
    bound1 = 1.0 / jnp.sqrt(state_dim)
    bound2 = 1.0 / jnp.sqrt(hidden_dim)
    w1 = jax.random.uniform(k1, (state_dim, hidden_dim), jnp.float32, -bound1, bound1)
    b1 = jax.random.uniform(k2, (hidden_dim,), jnp.float32, -bound1, bound1)
    w2 = jax.random.uniform(k3, (hidden_dim, 1), jnp.float32, -bound2, bound2)
    b2 = jax.random.uniform(k4, (1,), jnp.float32, -bound2, bound2)
    return w1, b1, w2, b2


if __name__ == "__main__":
    state_dim = 4
    hidden_dim = 32

    key = jax.random.PRNGKey(0)
    key_x, key_x2, key_p = jax.random.split(key, 3)
    w1, b1, w2, b2 = init_params(key_p, state_dim, hidden_dim)

    def ref_fn(x):
        return jnp.maximum(x @ w1 + b1, 0.0) @ w2 + b2

    # 1) Small demo batch, forcing the Pallas path (single tile, grid=1).
    x_small = jax.random.normal(key_x, (8, state_dim), jnp.float32)
    out_small = value_net_forward(x_small, w1, b1, w2, b2, use_pallas=True)
    jax.block_until_ready(out_small)
    assert out_small.shape == (8, 1)
    assert jnp.allclose(out_small, ref_fn(x_small), atol=1e-5, rtol=1e-5)

    # 2) Larger batch exercising the multi-tile / megacore-split path.
    x_big = jax.random.normal(key_x2, (4096, state_dim), jnp.float32)
    out_big = value_net_forward(x_big, w1, b1, w2, b2)
    jax.block_until_ready(out_big)
    assert out_big.shape == (4096, 1)
    assert jnp.allclose(out_big, ref_fn(x_big), atol=1e-5, rtol=1e-5)

    print("KERNEL_OK")
</pallas_src>

<mosaic_0001>
module attributes {stable_mosaic.version = 11 : i64} {
  func.func @value_net_kernel(%arg0: i32, %arg1: memref<8x4xf32, #tpu.memory_space<vmem>>, %arg2: memref<4x32xf32, #tpu.memory_space<vmem>>, %arg3: memref<1x32xf32, #tpu.memory_space<vmem>>, %arg4: memref<1x32xf32, #tpu.memory_space<vmem>>, %arg5: memref<1x1xf32, #tpu.memory_space<smem>>, %arg6: memref<8x1xf32, #tpu.memory_space<vmem>>) attributes {dimension_semantics = [#tpu.dimension_semantics<parallel>], iteration_bounds = array<i64: 1>, scalar_prefetch = 0 : i64, scratch_operands = 0 : i64, tpu.core_type = #tpu.core_type<tc>, window_params = [{transform_indices = @transform_0, window_bounds = array<i64: 8, 4>}, {pipeline_mode = #tpu.pipeline_mode<synchronous>, transform_indices = @transform_1, window_bounds = array<i64: 4, 32>}, {pipeline_mode = #tpu.pipeline_mode<synchronous>, transform_indices = @transform_2, window_bounds = array<i64: 1, 32>}, {pipeline_mode = #tpu.pipeline_mode<synchronous>, transform_indices = @transform_3, window_bounds = array<i64: 1, 32>}, {transform_indices = @transform_4, window_bounds = array<i64: 1, 1>}, {transform_indices = @transform_5, window_bounds = array<i64: 8, 1>}]} {
    %c0 = arith.constant 0 : index
    %c0_0 = arith.constant 0 : index
    %0 = vector.load %arg1[%c0, %c0_0] : memref<8x4xf32, #tpu.memory_space<vmem>>, vector<8x4xf32>
    %c0_1 = arith.constant 0 : index
    %c0_2 = arith.constant 0 : index
    %1 = vector.load %arg2[%c0_1, %c0_2] : memref<4x32xf32, #tpu.memory_space<vmem>>, vector<4x32xf32>
    %cst = arith.constant dense<0.000000e+00> : vector<8x32xf32>
    %2 = tpu.matmul %0, %1, %cst {dimension_numbers = #tpu.dot_dimension_numbers<[1], [0], [0], [1], [0, 0, 1, 1], [], []>} : vector<8x4xf32>, vector<4x32xf32>, vector<8x32xf32> -> vector<8x32xf32>
    %c0_3 = arith.constant 0 : index
    %c0_4 = arith.constant 0 : index
    %3 = vector.load %arg3[%c0_3, %c0_4] : memref<1x32xf32, #tpu.memory_space<vmem>>, vector<1x32xf32>
    %4 = vector.broadcast %3 : vector<1x32xf32> to vector<8x32xf32>
    %5 = arith.addf %2, %4 : vector<8x32xf32>
    %cst_5 = arith.constant 0.000000e+00 : f32
    %6 = vector.broadcast %cst_5 : f32 to vector<8x32xf32>
    %7 = arith.maximumf %5, %6 : vector<8x32xf32>
    %c0_6 = arith.constant 0 : index
    %c0_7 = arith.constant 0 : index
    %8 = vector.load %arg4[%c0_6, %c0_7] : memref<1x32xf32, #tpu.memory_space<vmem>>, vector<1x32xf32>
    %9 = vector.broadcast %8 : vector<1x32xf32> to vector<8x32xf32>
    %10 = arith.mulf %7, %9 : vector<8x32xf32>
    %cst_8 = arith.constant dense<0.000000e+00> : vector<8xf32>
    %11 = vector.multi_reduction <add>, %10, %cst_8 [1] : vector<8x32xf32> to vector<8xf32>
    %12 = vector.shape_cast %11 : vector<8xf32> to vector<8x1xf32>
    %c0_9 = arith.constant 0 : index
    %c0_10 = arith.constant 0 : index
    %13 = memref.load %arg5[%c0_9, %c0_10] : memref<1x1xf32, #tpu.memory_space<smem>>
    %14 = vector.broadcast %13 : f32 to vector<8x1xf32>
    %15 = arith.addf %12, %14 : vector<8x1xf32>
    %c0_11 = arith.constant 0 : index
    %c0_12 = arith.constant 0 : index
    %16 = vector.load %arg6[%c0_11, %c0_12] : memref<8x1xf32, #tpu.memory_space<vmem>>, vector<8x1xf32>
    tpu.vector_store %arg6[%c0_11, %c0_12], %15 {strides = array<i32>} : memref<8x1xf32, #tpu.memory_space<vmem>>, vector<8x1xf32>,
    return
  }
  func.func @transform_0(%arg0: i32) -> (i32, i32) {
    %c0_i32 = arith.constant 0 : i32
    %c0_i32_0 = arith.constant 0 : i32
    return %arg0, %c0_i32 : i32, i32
  }
  func.func @transform_1(%arg0: i32) -> (i32, i32) {
    %c0_i32 = arith.constant 0 : i32
    %c0_i32_0 = arith.constant 0 : i32
    %c0_i32_1 = arith.constant 0 : i32
    return %c0_i32, %c0_i32_0 : i32, i32
  }
  func.func @transform_2(%arg0: i32) -> (i32, i32) {
    %c0_i32 = arith.constant 0 : i32
    %c0_i32_0 = arith.constant 0 : i32
    %c0_i32_1 = arith.constant 0 : i32
    return %c0_i32, %c0_i32_0 : i32, i32
  }
  func.func @transform_3(%arg0: i32) -> (i32, i32) {
    %c0_i32 = arith.constant 0 : i32
    %c0_i32_0 = arith.constant 0 : i32
    %c0_i32_1 = arith.constant 0 : i32
    return %c0_i32, %c0_i32_0 : i32, i32
  }
  func.func @transform_4(%arg0: i32) -> (i32, i32) {
    %c0_i32 = arith.constant 0 : i32
    %c0_i32_0 = arith.constant 0 : i32
    %c0_i32_1 = arith.constant 0 : i32
    return %c0_i32, %c0_i32_0 : i32, i32
  }
  func.func @transform_5(%arg0: i32) -> (i32, i32) {
    %c0_i32 = arith.constant 0 : i32
    %c0_i32_0 = arith.constant 0 : i32
    return %arg0, %c0_i32 : i32, i32
  }
}

</mosaic_0001>

<bundles_post_ra>
// kernel: tpu_custom_call.1
= control target key start
LH: loop header
LB: loop body
LE: loop exit
PB: predicated region body
PF: predicated region fallthrough
CT: control target
= control target key end

     0   :  { %vm34_vm0 = vcmask 1043456   ;;  %vm30_vm1 = vcmask 31744   ;;  %v143_v0 = vmov 0.0   ;;  %vm144_vm2 = vmmov 0   ;;  %s193_s1 = inlined_call_operand.vmem [shape: f32[4,32], index: 1, kind: input, shape index: {}]   ;;  %s194_s0 = inlined_call_operand.vmem [shape: f32[8,4], index: 0, kind: input, shape index: {}]   ;;  %s195_s2 = inlined_call_operand.vmem [shape: f32[1,32], index: 2, kind: input, shape index: {}]   ;;  %s196_s3 = inlined_call_operand.vmem [shape: f32[1,32], index: 3, kind: input, shape index: {}]   ;;  %s197_s4 = inlined_call_operand.<no memory space> [shape: f32[1,1], index: 4, kind: input, shape index: {}]   ;;  %s198_s5 = inlined_call_operand.vmem [shape: f32[8,1], index: 5, kind: output, shape index: {}]  }
   0x1   :  { %136 = vmatprep.subr.mxu0 %v143_v0  ;;  %v22_v1 = vld [vmem:[%s193_s1] sm:$0xf]  ;;  %138 = vmatprep.mubr.msk.f32.mxu0 %vm144_vm2, %v143_v0  ;;  %vm117_vm3 = vcmask 261120   ;;  %v122_v11 = vstv %s197_s4  ;;  %vm124_vm4 = vcmask 7168  }
   0x2   :  { %v21_v2 = vld [vmem:[%s194_s0] sm:$0xff]  ;;  %137 = vmatpush3.msk.msra.mxu0 %vm34_vm0, %v22_v1 }
   0x3   :  { %139 = vmatmul.mubr.msk.f32.vlgmr.msra.gmra.mrb[0].mxu0 %vm30_vm1, %v21_v2  ;;  %v130_v3 = vld [vmem:[%s195_s2] ss:$0 sm:$0xff] }
   0x4   :  { %v133_v7 = vld [vmem:[%s196_s3] ss:$0 sm:$0xff] }
  0xd6   :  { %v104_v4 = vpop.f32.mrb[0].mxu0 }
  0xd7   :  { %v105_v5 = vadd.f32 %v130_v3, %v104_v4  ;;  %v140_v6 = vpop.f32.mrb[1].mxu0 }
  0xd9   :  { %v108_v8 = vmax.f32 %v105_v5, 0.0 }
  0xdb   :  { %v116_v9 = vmul.f32 %v133_v7, %v108_v8 }
  0xdd   :  { %v118_v10 = vsel %vm117_vm3, %v116_v9, 0.0 }
  0xde   :  { %119 = vadd.xlane.f32.xlu0 %v118_v10 }
 0x16b   :  { %v120_v12 = vpop.xlane.xlu0 %119 }
 0x16c   :  { %v123_v13 = vadd.f32 %v122_v11, %v120_v12 }
 0x16e   :  { %125 = vst.msk [vmem:[%s198_s5] sm:$0xff] %vm124_vm4, %v123_v13 }

</bundles_post_ra>
